<compile_context>
chip_gen: v5e
topology: v5e:2x2
jax: 0.10.0
libtpu: 0.0.40
codegen_flags: <defaults>
</compile_context>

<pallas_src>
import math
import numpy as np
import jax
import jax.numpy as jnp
from jax.experimental import pallas as pl
from jax.experimental.pallas import tpu as pltpu


# ------------------------- parameter construction -------------------------

def fixed_embedding_table(c_in: int, d_model: int) -> np.ndarray:
    """Matches FixedEmbedding.__init__ (sin/cos positional table)."""
    w = np.zeros((c_in, d_model), dtype=np.float32)
    position = np.arange(0, c_in, dtype=np.float32)[:, None]
    div_term = np.exp(
        np.arange(0, d_model, 2, dtype=np.float32) * -(math.log(10000.0) / d_model)
    )
    w[:, 0::2] = np.sin(position * div_term)
    w[:, 1::2] = np.cos(position * div_term)
    return w


def build_temporal_tables(d_model: int, freq: str = "h") -> np.ndarray:
    """Stacked, zero-padded per-feature tables, shape (F, V, D)."""
    minute_size, hour_size, weekday_size, day_size, month_size = 4, 24, 7, 32, 13
    # feature column order in x: 0=month, 1=day, 2=weekday, 3=hour, 4=minute
    sizes = [month_size, day_size, weekday_size, hour_size]
    if freq == "t":
        sizes.append(minute_size)
    v_max = max(sizes)  # 32
    tables = np.zeros((len(sizes), v_max, d_model), dtype=np.float32)
    for f, c_in in enumerate(sizes):
        tables[f, :c_in, :] = fixed_embedding_table(c_in, d_model)
    return tables


# ------------------------------- kernel -----------------------------------

def temporal_embed_kernel(idx_ref, table_ref, out_ref):
    # idx_ref:   (Tr, C)        int32   C = fold*F folded feature columns
    # table_ref: (C*V, fold*D)  bf16    block-diagonal stacked embedding tables
    # out_ref:   (Tr, fold*D)   f32     lane-dense output slab
    idx = idx_ref[...]
    tr, c_cols = idx.shape
    k = table_ref.shape[0]
    vocab = k // c_cols

    # Combined one-hot over all (fold x feature) bands: column c*V + idx[:, c].
    lane_iota = jax.lax.broadcasted_iota(jnp.int32, (tr, k), 1)
    hit = None
    for c in range(c_cols):  # static unroll: C <= 20
        m = lane_iota == (idx[:, c:c + 1] + c * vocab)
        hit = m if hit is None else (hit | m)

    onehot = hit.astype(jnp.bfloat16)  # bf16 MXU input; accumulate in f32
    out_ref[...] = jnp.dot(onehot, table_ref[...],
                           preferred_element_type=jnp.float32)


# ------------------------------- wrapper -----------------------------------

def temporal_embedding(x: jax.Array, tables: jax.Array, *, row_tile: int = 512):
    """x: [B, L, F] int; tables: [F, V, D] f32 -> [B, L, D] f32."""
    b, l, n_feat = x.shape
    f_t, vocab, d = tables.shape
    assert f_t == n_feat, "feature count of x must match number of tables"

    # Lane-density fold: pack `fold` consecutive rows into the lane axis so the
    # output block last dim is a full multiple of 128 (unmasked stores).
    fold = 128 // d if (d < 128 and 128 % d == 0) else 1

    # Stacked (F*V, D) table; block-diagonal over the fold; bf16 for the MXU.
    stacked = jnp.asarray(tables, jnp.float32).reshape(n_feat * vocab, d)
    table_kernel = jnp.kron(jnp.eye(fold, dtype=jnp.float32),
                            stacked).astype(jnp.bfloat16)  # (fold*F*V, fold*D)

    rows = b * l
    unit = 8 * fold  # keep folded sublane dim a multiple of 8
    row_tile = max(unit, (row_tile // unit) * unit)
    rows_min = ((rows + unit - 1) // unit) * unit
    row_tile = min(row_tile, rows_min)          # don't over-pad tiny inputs
    rows_padded = ((rows + row_tile - 1) // row_tile) * row_tile

    # Padded rows use index 0 (valid) and are sliced off at the end.
    idx = jnp.reshape(x.astype(jnp.int32), (rows, n_feat))
    idx = jnp.pad(idx, ((0, rows_padded - rows), (0, 0)))
    idx_folded = idx.reshape(rows_padded // fold, fold * n_feat)

    tr = row_tile // fold           # folded rows per grid step
    k = fold * n_feat * vocab       # contraction depth (128 for freq='h', fold=1)
    dd = fold * d                   # lane-dense output width

    grid = (rows_padded // row_tile,)
    out = pl.pallas_call(
        temporal_embed_kernel,
        out_shape=jax.ShapeDtypeStruct((rows_padded // fold, dd), jnp.float32),
        grid=grid,
        in_specs=[
            pl.BlockSpec((tr, fold * n_feat), lambda i: (i, 0)),
            pl.BlockSpec((k, dd), lambda i: (0, 0)),  # table resident across steps
        ],
        out_specs=pl.BlockSpec((tr, dd), lambda i: (i, 0)),
        compiler_params=pltpu.CompilerParams(
            dimension_semantics=("parallel",)),  # shards grid across TCs on v7x
    )(idx_folded, table_kernel)

    return out.reshape(rows_padded, d)[:rows].reshape(b, l, d)


# ------------------------------- main --------------------------------------

if __name__ == "__main__":
    d_model = 32
    freq = "h"                      # default TemporalEmbedding(freq='h'): no minute embed
    B, L = 2, 8
    n_feat = 4                      # month, day, weekday, hour

    tables = jnp.asarray(build_temporal_tables(d_model, freq))  # (4, 32, 32) f32

    key = jax.random.PRNGKey(0)
    k0, k1, k2, k3 = jax.random.split(key, 4)
    month = jax.random.randint(k0, (B, L), 0, 13)
    day = jax.random.randint(k1, (B, L), 0, 32)
    weekday = jax.random.randint(k2, (B, L), 0, 7)
    hour = jax.random.randint(k3, (B, L), 0, 24)
    x = jnp.stack([month, day, weekday, hour], axis=-1).astype(jnp.int32)

    out = jax.block_until_ready(temporal_embedding(x, tables))

    # Exactness check against the same bf16-quantized tables the kernel feeds
    # the MXU (gather + f32 sum should match to f32 rounding).
    tab_q = tables.astype(jnp.bfloat16).astype(jnp.float32)
    ref_q = sum(jnp.take(tab_q[f], x[..., f], axis=0) for f in range(n_feat))
    np.testing.assert_allclose(np.asarray(out), np.asarray(ref_q),
                               rtol=1e-5, atol=1e-5)

    # Check against full-f32 module semantics (tolerance = bf16 table rounding).
    ref = sum(jnp.take(tables[f], x[..., f], axis=0) for f in range(n_feat))
    np.testing.assert_allclose(np.asarray(out), np.asarray(ref),
                               rtol=2e-2, atol=2e-2)

    print("KERNEL_OK")
</pallas_src>

<mosaic_0001>
module attributes {stable_mosaic.version = 11 : i64} {
  func.func @temporal_embed_kernel(%arg0: i32, %arg1: memref<8x16xi32, #tpu.memory_space<vmem>>, %arg2: memref<512x128xbf16, #tpu.memory_space<vmem>>, %arg3: memref<8x128xf32, #tpu.memory_space<vmem>>) attributes {dimension_semantics = [#tpu.dimension_semantics<parallel>], iteration_bounds = array<i64: 1>, scalar_prefetch = 0 : i64, scratch_operands = 0 : i64, tpu.core_type = #tpu.core_type<tc>, window_params = [{transform_indices = @transform_0, window_bounds = array<i64: 8, 16>}, {pipeline_mode = #tpu.pipeline_mode<synchronous>, transform_indices = @transform_1, window_bounds = array<i64: 512, 128>}, {transform_indices = @transform_2, window_bounds = array<i64: 8, 128>}]} {
    %c0 = arith.constant 0 : index
    %c0_0 = arith.constant 0 : index
    %0 = vector.load %arg1[%c0, %c0_0] : memref<8x16xi32, #tpu.memory_space<vmem>>, vector<8x16xi32>
    %1 = tpu.iota {dimensions = array<i32: 1>} : vector<8x512xi32>
    %2 = vector.extract_strided_slice %0 {offsets = [0, 0], sizes = [8, 1], strides = [1, 1]} : vector<8x16xi32> to vector<8x1xi32>
    %c0_i32 = arith.constant 0 : i32
    %3 = vector.broadcast %c0_i32 : i32 to vector<8x1xi32>
    %4 = arith.addi %2, %3 : vector<8x1xi32>
    %5 = vector.broadcast %4 : vector<8x1xi32> to vector<8x512xi32>
    %6 = arith.cmpi eq, %1, %5 : vector<8x512xi32>
    %7 = vector.extract_strided_slice %0 {offsets = [0, 1], sizes = [8, 1], strides = [1, 1]} : vector<8x16xi32> to vector<8x1xi32>
    %c32_i32 = arith.constant 32 : i32
    %8 = vector.broadcast %c32_i32 : i32 to vector<8x1xi32>
    %9 = arith.addi %7, %8 : vector<8x1xi32>
    %10 = vector.broadcast %9 : vector<8x1xi32> to vector<8x512xi32>
    %11 = arith.cmpi eq, %1, %10 : vector<8x512xi32>
    %12 = arith.ori %6, %11 : vector<8x512xi1>
    %13 = vector.extract_strided_slice %0 {offsets = [0, 2], sizes = [8, 1], strides = [1, 1]} : vector<8x16xi32> to vector<8x1xi32>
    %c64_i32 = arith.constant 64 : i32
    %14 = vector.broadcast %c64_i32 : i32 to vector<8x1xi32>
    %15 = arith.addi %13, %14 : vector<8x1xi32>
    %16 = vector.broadcast %15 : vector<8x1xi32> to vector<8x512xi32>
    %17 = arith.cmpi eq, %1, %16 : vector<8x512xi32>
    %18 = arith.ori %12, %17 : vector<8x512xi1>
    %19 = vector.extract_strided_slice %0 {offsets = [0, 3], sizes = [8, 1], strides = [1, 1]} : vector<8x16xi32> to vector<8x1xi32>
    %c96_i32 = arith.constant 96 : i32
    %20 = vector.broadcast %c96_i32 : i32 to vector<8x1xi32>
    %21 = arith.addi %19, %20 : vector<8x1xi32>
    %22 = vector.broadcast %21 : vector<8x1xi32> to vector<8x512xi32>
    %23 = arith.cmpi eq, %1, %22 : vector<8x512xi32>
    %24 = arith.ori %18, %23 : vector<8x512xi1>
    %25 = vector.extract_strided_slice %0 {offsets = [0, 4], sizes = [8, 1], strides = [1, 1]} : vector<8x16xi32> to vector<8x1xi32>
    %c128_i32 = arith.constant 128 : i32
    %26 = vector.broadcast %c128_i32 : i32 to vector<8x1xi32>
    %27 = arith.addi %25, %26 : vector<8x1xi32>
    %28 = vector.broadcast %27 : vector<8x1xi32> to vector<8x512xi32>
    %29 = arith.cmpi eq, %1, %28 : vector<8x512xi32>
    %30 = arith.ori %24, %29 : vector<8x512xi1>
    %31 = vector.extract_strided_slice %0 {offsets = [0, 5], sizes = [8, 1], strides = [1, 1]} : vector<8x16xi32> to vector<8x1xi32>
    %c160_i32 = arith.constant 160 : i32
    %32 = vector.broadcast %c160_i32 : i32 to vector<8x1xi32>
    %33 = arith.addi %31, %32 : vector<8x1xi32>
    %34 = vector.broadcast %33 : vector<8x1xi32> to vector<8x512xi32>
    %35 = arith.cmpi eq, %1, %34 : vector<8x512xi32>
    %36 = arith.ori %30, %35 : vector<8x512xi1>
    %37 = vector.extract_strided_slice %0 {offsets = [0, 6], sizes = [8, 1], strides = [1, 1]} : vector<8x16xi32> to vector<8x1xi32>
    %c192_i32 = arith.constant 192 : i32
    %38 = vector.broadcast %c192_i32 : i32 to vector<8x1xi32>
    %39 = arith.addi %37, %38 : vector<8x1xi32>
    %40 = vector.broadcast %39 : vector<8x1xi32> to vector<8x512xi32>
    %41 = arith.cmpi eq, %1, %40 : vector<8x512xi32>
    %42 = arith.ori %36, %41 : vector<8x512xi1>
    %43 = vector.extract_strided_slice %0 {offsets = [0, 7], sizes = [8, 1], strides = [1, 1]} : vector<8x16xi32> to vector<8x1xi32>
    %c224_i32 = arith.constant 224 : i32
    %44 = vector.broadcast %c224_i32 : i32 to vector<8x1xi32>
    %45 = arith.addi %43, %44 : vector<8x1xi32>
    %46 = vector.broadcast %45 : vector<8x1xi32> to vector<8x512xi32>
    %47 = arith.cmpi eq, %1, %46 : vector<8x512xi32>
    %48 = arith.ori %42, %47 : vector<8x512xi1>
    %49 = vector.extract_strided_slice %0 {offsets = [0, 8], sizes = [8, 1], strides = [1, 1]} : vector<8x16xi32> to vector<8x1xi32>
    %c256_i32 = arith.constant 256 : i32
    %50 = vector.broadcast %c256_i32 : i32 to vector<8x1xi32>
    %51 = arith.addi %49, %50 : vector<8x1xi32>
    %52 = vector.broadcast %51 : vector<8x1xi32> to vector<8x512xi32>
    %53 = arith.cmpi eq, %1, %52 : vector<8x512xi32>
    %54 = arith.ori %48, %53 : vector<8x512xi1>
    %55 = vector.extract_strided_slice %0 {offsets = [0, 9], sizes = [8, 1], strides = [1, 1]} : vector<8x16xi32> to vector<8x1xi32>
    %c288_i32 = arith.constant 288 : i32
    %56 = vector.broadcast %c288_i32 : i32 to vector<8x1xi32>
    %57 = arith.addi %55, %56 : vector<8x1xi32>
    %58 = vector.broadcast %57 : vector<8x1xi32> to vector<8x512xi32>
    %59 = arith.cmpi eq, %1, %58 : vector<8x512xi32>
    %60 = arith.ori %54, %59 : vector<8x512xi1>
    %61 = vector.extract_strided_slice %0 {offsets = [0, 10], sizes = [8, 1], strides = [1, 1]} : vector<8x16xi32> to vector<8x1xi32>
    %c320_i32 = arith.constant 320 : i32
    %62 = vector.broadcast %c320_i32 : i32 to vector<8x1xi32>
    %63 = arith.addi %61, %62 : vector<8x1xi32>
    %64 = vector.broadcast %63 : vector<8x1xi32> to vector<8x512xi32>
    %65 = arith.cmpi eq, %1, %64 : vector<8x512xi32>
    %66 = arith.ori %60, %65 : vector<8x512xi1>
    %67 = vector.extract_strided_slice %0 {offsets = [0, 11], sizes = [8, 1], strides = [1, 1]} : vector<8x16xi32> to vector<8x1xi32>
    %c352_i32 = arith.constant 352 : i32
    %68 = vector.broadcast %c352_i32 : i32 to vector<8x1xi32>
    %69 = arith.addi %67, %68 : vector<8x1xi32>
    %70 = vector.broadcast %69 : vector<8x1xi32> to vector<8x512xi32>
    %71 = arith.cmpi eq, %1, %70 : vector<8x512xi32>
    %72 = arith.ori %66, %71 : vector<8x512xi1>
    %73 = vector.extract_strided_slice %0 {offsets = [0, 12], sizes = [8, 1], strides = [1, 1]} : vector<8x16xi32> to vector<8x1xi32>
    %c384_i32 = arith.constant 384 : i32
    %74 = vector.broadcast %c384_i32 : i32 to vector<8x1xi32>
    %75 = arith.addi %73, %74 : vector<8x1xi32>
    %76 = vector.broadcast %75 : vector<8x1xi32> to vector<8x512xi32>
    %77 = arith.cmpi eq, %1, %76 : vector<8x512xi32>
    %78 = arith.ori %72, %77 : vector<8x512xi1>
    %79 = vector.extract_strided_slice %0 {offsets = [0, 13], sizes = [8, 1], strides = [1, 1]} : vector<8x16xi32> to vector<8x1xi32>
    %c416_i32 = arith.constant 416 : i32
    %80 = vector.broadcast %c416_i32 : i32 to vector<8x1xi32>
    %81 = arith.addi %79, %80 : vector<8x1xi32>
    %82 = vector.broadcast %81 : vector<8x1xi32> to vector<8x512xi32>
    %83 = arith.cmpi eq, %1, %82 : vector<8x512xi32>
    %84 = arith.ori %78, %83 : vector<8x512xi1>
    %85 = vector.extract_strided_slice %0 {offsets = [0, 14], sizes = [8, 1], strides = [1, 1]} : vector<8x16xi32> to vector<8x1xi32>
    %c448_i32 = arith.constant 448 : i32
    %86 = vector.broadcast %c448_i32 : i32 to vector<8x1xi32>
    %87 = arith.addi %85, %86 : vector<8x1xi32>
    %88 = vector.broadcast %87 : vector<8x1xi32> to vector<8x512xi32>
    %89 = arith.cmpi eq, %1, %88 : vector<8x512xi32>
    %90 = arith.ori %84, %89 : vector<8x512xi1>
    %91 = vector.extract_strided_slice %0 {offsets = [0, 15], sizes = [8, 1], strides = [1, 1]} : vector<8x16xi32> to vector<8x1xi32>
    %c480_i32 = arith.constant 480 : i32
    %92 = vector.broadcast %c480_i32 : i32 to vector<8x1xi32>
    %93 = arith.addi %91, %92 : vector<8x1xi32>
    %94 = vector.broadcast %93 : vector<8x1xi32> to vector<8x512xi32>
    %95 = arith.cmpi eq, %1, %94 : vector<8x512xi32>
    %96 = arith.ori %90, %95 : vector<8x512xi1>
    %97 = arith.extui %96 : vector<8x512xi1> to vector<8x512xi32>
    %98 = arith.sitofp %97 : vector<8x512xi32> to vector<8x512xf32>
    %99 = arith.truncf %98 : vector<8x512xf32> to vector<8x512xbf16>
    %c0_1 = arith.constant 0 : index
    %c0_2 = arith.constant 0 : index
    %100 = vector.load %arg2[%c0_1, %c0_2] : memref<512x128xbf16, #tpu.memory_space<vmem>>, vector<512x128xbf16>
    %cst = arith.constant dense<0.000000e+00> : vector<8x128xf32>
    %101 = tpu.matmul %99, %100, %cst {dimension_numbers = #tpu.dot_dimension_numbers<[1], [0], [0], [1], [0, 0, 1, 1], [], []>} : vector<8x512xbf16>, vector<512x128xbf16>, vector<8x128xf32> -> vector<8x128xf32>
    %c0_3 = arith.constant 0 : index
    %c0_4 = arith.constant 0 : index
    %102 = vector.load %arg3[%c0_3, %c0_4] : memref<8x128xf32, #tpu.memory_space<vmem>>, vector<8x128xf32>
    tpu.vector_store %arg3[%c0_3, %c0_4], %101 {strides = array<i32>} : memref<8x128xf32, #tpu.memory_space<vmem>>, vector<8x128xf32>,
    return
  }
  func.func @transform_0(%arg0: i32) -> (i32, i32) {
    %c0_i32 = arith.constant 0 : i32
    %c0_i32_0 = arith.constant 0 : i32
    return %arg0, %c0_i32 : i32, i32
  }
  func.func @transform_1(%arg0: i32) -> (i32, i32) {
    %c0_i32 = arith.constant 0 : i32
    %c0_i32_0 = arith.constant 0 : i32
    %c0_i32_1 = arith.constant 0 : i32
    return %c0_i32, %c0_i32_0 : i32, i32
  }
  func.func @transform_2(%arg0: i32) -> (i32, i32) {
    %c0_i32 = arith.constant 0 : i32
    %c0_i32_0 = arith.constant 0 : i32
    return %arg0, %c0_i32 : i32, i32
  }
}

</mosaic_0001>

<bundles_post_ra>
// kernel: tpu_custom_call.1
= control target key start
LH: loop header
LB: loop body
LE: loop exit
PB: predicated region body
PF: predicated region fallthrough
CT: control target
= control target key end

     0   :  { %7 = vsyncpa [#allocation3], 0  ;;  %s1126_s0 = inlined_call_operand.hbm [shape: s32[8,16], index: 0, kind: input, shape index: {}]   ;;  %s1127_s1 = inlined_call_operand.hbm [shape: bf16[512,128], index: 1, kind: input, shape index: {}]   ;;  %s1128_s2 = inlined_call_operand.hbm [shape: f32[8,128], index: 2, kind: output, shape index: {}]  }
   0x1   :  { %8 = vsyncpa [#allocation6], 0 }
   0x2   :  { %9 = vsyncpa [#allocation4], 0  ;;  %s15_s11 = sshll.u32 %s1126_s0, 4  ;;  %s855_s12 = smov [#allocation2]   ;;  %s16_s11 = int_to_ptr.hbm [resolvable:$true] %s15_s11 }
   0x3   :  { %s17_s13 = sshll.u32 %s855_s12, 4  ;;  %s25_s16 = sshll.u32 %s1127_s1, 4  ;;  %s18_s13 = int_to_ptr.vmem [resolvable:$true] %s17_s13  ;;  %s26_s16 = int_to_ptr.hbm [resolvable:$true] %s25_s16 }
   0x4   :  { %20 = dma.hbm_to_vmem [thread:$0]  %s16_s11, 128, %s18_s13, [#allocation3]  }
   0x5   :  { %s856_s17 = smov [#allocation5]   ;;  %s857_s19 = smov 64  }
   0x6   :  { %s27_s18 = sshll.u32 %s856_s17, 4  ;;  %s858_s20 = smov 4   ;;  %s28_s18 = int_to_ptr.vmem [resolvable:$true] %s27_s18 }
   0x7   :  { %33 = dma.hbm_to_vmem [thread:$0]  %s26_s16, 4096, %s28_s18, [#allocation6], %s857_s19, %s857_s19, %s858_s20  }
   0x8   :  { %849 = dma.done.wait [#allocation3], 128  }
   0x9   :  { %850 = vsyncadd [#allocation3], 4294967168 }
   0xa   :  { %851 = dma.done.wait [#allocation6], 4096  }
   0xb   :  { %852 = vsyncadd [#allocation6], 4294963200  ;;  %v859_v0 = vmov 0   ;;  %v860_v1 = vmov 2   ;;  %v861_v2 = vmov 4   ;;  %v42_v3 = vld [vmem:[#allocation2] sm:$0xff]  ;;  %v43_v32 = vlaneseq }
   0xc   :  { %760 = vset.pattern.permute.xlu0 %v859_v0  ;;  %762 = vset.pattern.permute.xlu1 %v860_v1  ;;  %v67_v4 = vadd.s32 64, %v42_v3  ;;  %v91_v5 = vadd.s32 128, %v42_v3  ;;  %v55_v6 = vadd.s32 32, %v42_v3  ;;  %v79_v7 = vadd.s32 96, %v42_v3  ;;  %v713_v37 = vld [vmem:[#allocation5 + $0x38] sm:$0xff]  ;;  %v712_v45 = vld [vmem:[#allocation5 + $0x30] sm:$0xff] }
   0xd   :  { %764 = vset.pattern.permute.xlu2 %v861_v2  ;;  %49 = vperm.xlu0 %760, %v42_v3   ;;  %v862_v8 = vmov 1   ;;  %v103_v9 = vadd.s32 160, %v42_v3  ;;  %v863_v10 = vmov 3   ;;  %v864_v11 = vmov 5   ;;  %v721_v38 = vld [vmem:[#allocation5 + $0x78] sm:$0xff]  ;;  %v720_v46 = vld [vmem:[#allocation5 + $0x70] sm:$0xff] }
   0xe   :  { %69 = vperm.xlu1 %762, %v67_v4   ;;  %93 = vperm.xlu2 %764, %v91_v5   ;;  %v139_v12 = vadd.s32 256, %v42_v3  ;;  %v115_v13 = vadd.s32 192, %v42_v3  ;;  %v865_v14 = vmov 8   ;;  %v127_v15 = vadd.s32 224, %v42_v3  ;;  %v729_v39 = vld [vmem:[#allocation5 + $0xb8] sm:$0xff]  ;;  %v728_v47 = vld [vmem:[#allocation5 + $0xb0] sm:$0xff] }
   0xf   :  { %v866_v16 = vmov 6   ;;  %v867_v17 = vmov 7   ;;  %v199_v18 = vadd.s32 416, %v42_v3  ;;  %v151_v19 = vadd.s32 288, %v42_v3  ;;  %v737_v42 = vld [vmem:[#allocation5 + $0xf8] sm:$0xff]  ;;  %503 = vmatpush.bf16.msra.mxu0 %v713_v37  ;;  %516 = vmatpush.bf16.msra.mxu1 %v721_v38  ;;  %v736_v48 = vld [vmem:[#allocation5 + $0xf0] sm:$0xff] }
  0x10   :  { %v868_v20 = vmov 13   ;;  %v163_v21 = vadd.s32 320, %v42_v3  ;;  %v869_v22 = vmov 9   ;;  %v870_v23 = vmov 10   ;;  %529 = vmatpush.bf16.msra.mxu2 %v729_v39  ;;  %542 = vmatpush.bf16.msra.mxu3 %v737_v42  ;;  %v711_v53 = vld [vmem:[#allocation5 + $0x28] sm:$0xff]  ;;  %v710_v61 = vld [vmem:[#allocation5 + $0x20] sm:$0xff] }
  0x11   :  { %v175_v24 = vadd.s32 352, %v42_v3  ;;  %v187_v25 = vadd.s32 384, %v42_v3  ;;  %v871_v26 = vmov 15   ;;  %v872_v27 = vmov 11   ;;  %v719_v54 = vld [vmem:[#allocation5 + $0x68] sm:$0xff]  ;;  %v718_v62 = vld [vmem:[#allocation5 + $0x60] sm:$0xff] }
  0x12   :  { %v873_v28 = vmov 12   ;;  %v211_v29 = vadd.s32 448, %v42_v3  ;;  %v223_v30 = vadd.s32 480, %v42_v3  ;;  %v874_v31 = vmov 14   ;;  %v727_v56 = vld [vmem:[#allocation5 + $0xa8] sm:$0xff]  ;;  %v726_v0 = vld [vmem:[#allocation5 + $0xa0] sm:$0xff] }
  0x13   :  { %v898_v34 = vand.u32 127, %v43_v32  ;;  %504 = vmatpush.bf16.msra.mxu0 %v712_v45  ;;  %517 = vmatpush.bf16.msra.mxu1 %v720_v46  ;;  %v735_v57 = vld [vmem:[#allocation5 + $0xe8] sm:$0xff]  ;;  %v734_v1 = vld [vmem:[#allocation5 + $0xe0] sm:$0xff]  ;;  %v709_v4 = vld [vmem:[#allocation5 + $0x18] sm:$0xff]  ;;  %v1171_v46 = vmov 0  ;;  %s876_s0 = smov [#allocation7]  }
  0x14   :  { %530 = vmatpush.bf16.msra.mxu2 %v728_v47  ;;  %543 = vmatpush.bf16.msra.mxu3 %v736_v48  ;;  %v714_v32 = vld [vmem:[#allocation5 + $0x40] sm:$0xff]  ;;  %v875_v47 = vmov 0.0   ;;  %s561_s1 = sshll.u32 %s876_s0, 4  ;;  %s563_s23 = sshll.u32 %s1128_s2, 4  ;;  %s562_s1 = int_to_ptr.vmem [resolvable:$true] %s561_s1  ;;  %s564_s23 = int_to_ptr.hbm [resolvable:$true] %s563_s23 }
  0x15   :  { %761 = vset.pattern.permute.xlu0 %v862_v8  ;;  %v901_v36 = vadd.s32 128, %v898_v34  ;;  %v904_v40 = vadd.s32 256, %v898_v34  ;;  %v910_v43 = vadd.s32 384, %v898_v34 }
  0x16   :  { %57 = vperm.xlu0 %761, %v55_v6   ;;  %763 = vset.pattern.permute.xlu1 %v863_v10  ;;  %v717_v6 = vld [vmem:[#allocation5 + $0x58] sm:$0xff] }
  0x17   :  { %81 = vperm.xlu1 %763, %v79_v7   ;;  %765 = vset.pattern.permute.xlu2 %v864_v11  ;;  %v725_v7 = vld [vmem:[#allocation5 + $0x98] sm:$0xff] }
  0x18   :  { %105 = vperm.xlu2 %765, %v103_v9   ;;  %505 = vmatpush.bf16.msra.mxu0 %v711_v53  ;;  %v733_v9 = vld [vmem:[#allocation5 + $0xd8] sm:$0xff] }
  0x19   :  { %518 = vmatpush.bf16.msra.mxu1 %v719_v54  ;;  %531 = vmatpush.bf16.msra.mxu2 %v727_v56 }
  0x1a   :  { %544 = vmatpush.bf16.msra.mxu3 %v735_v57 }
  0x1c   :  { %506 = vmatpush.bf16.msra.mxu0 %v710_v61 }
  0x1d   :  { %519 = vmatpush.bf16.msra.mxu1 %v718_v62  ;;  %532 = vmatpush.bf16.msra.mxu2 %v726_v0 }
  0x1e   :  { %768 = vset.pattern.permute.xlu0 %v865_v14  ;;  %545 = vmatpush.bf16.msra.mxu3 %v734_v1  ;;  %v708_v14 = vld [vmem:[#allocation5 + $0x10] sm:$0xff] }
  0x1f   :  { %141 = vperm.xlu0 %768, %v139_v12   ;;  %766 = vset.pattern.permute.xlu1 %v866_v16 }
  0x20   :  { %117 = vperm.xlu1 %766, %v115_v13   ;;  %767 = vset.pattern.permute.xlu2 %v867_v17  ;;  %v724_v17 = vld [vmem:[#allocation5 + $0x90] sm:$0xff] }
  0x21   :  { %129 = vperm.xlu2 %767, %v127_v15   ;;  %507 = vmatpush.bf16.msra.mxu0 %v709_v4  ;;  %v716_v15 = vld [vmem:[#allocation5 + $0x50] sm:$0xff] }
  0x22   :  { %520 = vmatpush.bf16.msra.mxu1 %v717_v6  ;;  %533 = vmatpush.bf16.msra.mxu2 %v725_v7 }
  0x23   :  { %546 = vmatpush.bf16.msra.mxu3 %v733_v9 }
  0x25   :  { %508 = vmatpush.bf16.msra.mxu0 %v708_v14 }
  0x26   :  { %521 = vmatpush.bf16.msra.mxu1 %v716_v15  ;;  %534 = vmatpush.bf16.msra.mxu2 %v724_v17 }
  0x27   :  { %773 = vset.pattern.permute.xlu0 %v868_v20  ;;  %v707_v20 = vld [vmem:[#allocation5 + $0x8] sm:$0xff] }
  0x28   :  { %201 = vperm.xlu0 %773, %v199_v18   ;;  %769 = vset.pattern.permute.xlu1 %v869_v22  ;;  %v732_v18 = vld [vmem:[#allocation5 + $0xd0] sm:$0xff] }
  0x29   :  { %153 = vperm.xlu1 %769, %v151_v19   ;;  %770 = vset.pattern.permute.xlu2 %v870_v23  ;;  %v723_v23 = vld [vmem:[#allocation5 + $0x88] sm:$0xff] }
  0x2a   :  { %165 = vperm.xlu2 %770, %v163_v21   ;;  %v715_v21 = vld [vmem:[#allocation5 + $0x48] sm:$0xff]  ;;  %547 = vmatpush.bf16.msra.mxu3 %v732_v18 }
  0x2b   :  { %509 = vmatpush.bf16.msra.mxu0 %v707_v20  ;;  %522 = vmatpush.bf16.msra.mxu1 %v715_v21 }
  0x2c   :  { %535 = vmatpush.bf16.msra.mxu2 %v723_v23 }
  0x2f   :  { %523 = vmatpush.bf16.msra.mxu1 %v714_v32 }
  0x30   :  { %776 = vset.pattern.permute.xlu0 %v871_v26 }
  0x31   :  { %771 = vset.pattern.permute.xlu1 %v872_v27 }
  0x32   :  { %177 = vperm.xlu1 %771, %v175_v24   ;;  %772 = vset.pattern.permute.xlu2 %v873_v28  ;;  %v731_v24 = vld [vmem:[#allocation5 + $0xc8] sm:$0xff] }
  0x33   :  { %189 = vperm.xlu2 %772, %v187_v25   ;;  %548 = vmatpush.bf16.msra.mxu3 %v731_v24 }
  0x3a   :  { %774 = vset.pattern.permute.xlu1 %v874_v31 }
  0x3b   :  { %213 = vperm.xlu1 %774, %v211_v29   ;;  %775 = vset.pattern.permute.xlu2 %v871_v26 }
  0x3c   :  { %225 = vperm.xlu2 %775, %v223_v30   ;;  %v706_v30 = vld [vmem:[#allocation5] sm:$0xff] }
  0x3d   :  { %510 = vmatpush.bf16.msra.mxu0 %v706_v30 }
  0x68   :  { %v907_v41 = vpop.permute.xlu2 %93 }
  0x72   :  { %v106_v60 = vpop.permute.xlu2 %105 }
  0x7b   :  { %v130_v12 = vpop.permute.xlu2 %129 }
  0x7f   :  { %v50_v33 = vpop.permute.xlu0 %49 }
  0x80   :  { %v70_v35 = vpop.permute.xlu1 %69  ;;  %vm51_vm0 = vcmp.eq.s32.totalorder %v898_v34, %v50_v33  ;;  %vm52_vm1 = vcmp.eq.s32.totalorder %v901_v36, %v50_v33  ;;  %vm53_vm2 = vcmp.eq.s32.totalorder %v904_v40, %v50_v33  ;;  %vm54_vm6 = vcmp.eq.s32.totalorder %v910_v43, %v50_v33  ;;  %v722_v33 = vld [vmem:[#allocation5 + $0x80] sm:$0xff] }
  0x81   :  { %vm71_vm11 = vcmp.eq.s32.totalorder %v898_v34, %v70_v35  ;;  %vm72_vm13 = vcmp.eq.s32.totalorder %v901_v36, %v70_v35  ;;  %vm73_vm15 = vcmp.eq.s32.totalorder %v904_v40, %v70_v35  ;;  %536 = vmatpush.bf16.msra.mxu2 %v722_v33 }
  0x84   :  { %v166_v37 = vpop.permute.xlu2 %165 }
  0x88   :  { %v58_v44 = vpop.permute.xlu0 %57 }
  0x89   :  { %vm59_vm3 = vcmp.eq.s32.totalorder %v898_v34, %v58_v44  ;;  %vm60_vm4 = vcmp.eq.s32.totalorder %v901_v36, %v58_v44  ;;  %vm61_vm5 = vcmp.eq.s32.totalorder %v904_v40, %v58_v44  ;;  %vm62_vm7 = vcmp.eq.s32.totalorder %v910_v43, %v58_v44  ;;  %v82_v50 = vpop.permute.xlu1 %81 }
  0x8a   :  { %vm63_vm8 = vmor %vm51_vm0, %vm59_vm3 }
  0x8b   :  { %vm64_vm9 = vmor %vm52_vm1, %vm60_vm4  ;;  %vm83_vm1 = vcmp.eq.s32.totalorder %v898_v34, %v82_v50  ;;  %vm84_vm4 = vcmp.eq.s32.totalorder %v901_v36, %v82_v50 }
  0x8c   :  { %vm923_vm10 = vmor %vm53_vm2, %vm61_vm5  ;;  %vm74_vm2 = vcmp.eq.s32.totalorder %v910_v43, %v70_v35  ;;  %v730_v35 = vld [vmem:[#allocation5 + $0xc0] sm:$0xff] }
  0x8d   :  { %vm928_vm12 = vmor %vm54_vm6, %vm62_vm7  ;;  %vm85_vm6 = vcmp.eq.s32.totalorder %v904_v40, %v82_v50  ;;  %vm86_vm7 = vcmp.eq.s32.totalorder %v910_v43, %v82_v50  ;;  %549 = vmatpush.bf16.msra.mxu3 %v730_v35  ;;  %v190_v39 = vpop.permute.xlu2 %189 }
  0x8e   :  { %vm933_vm14 = vmor %vm63_vm8, %vm71_vm11  ;;  %vm95_vm11 = vcmp.eq.s32.totalorder %v898_v34, %v907_v41 }
  0x8f   :  { %vm938_vm0 = vmor %vm64_vm9, %vm72_vm13  ;;  %vm96_vm13 = vcmp.eq.s32.totalorder %v901_v36, %v907_v41 }
  0x90   :  { %vm946_vm3 = vmor %vm923_vm10, %vm73_vm15  ;;  %vm97_vm15 = vcmp.eq.s32.totalorder %v904_v40, %v907_v41 }
  0x91   :  { %vm953_vm5 = vmor %vm928_vm12, %vm74_vm2  ;;  %vm98_vm2 = vcmp.eq.s32.totalorder %v910_v43, %v907_v41  ;;  %v142_v26 = vpop.permute.xlu0 %141 }
  0x92   :  { %vm963_vm8 = vmor %vm933_vm14, %vm83_vm1  ;;  %vm107_vm1 = vcmp.eq.s32.totalorder %v898_v34, %v106_v60  ;;  %v118_v10 = vpop.permute.xlu1 %117 }
  0x93   :  { %vm969_vm9 = vmor %vm938_vm0, %vm84_vm4  ;;  %vm108_vm4 = vcmp.eq.s32.totalorder %v901_v36, %v106_v60 }
  0x94   :  { %vm975_vm10 = vmor %vm946_vm3, %vm85_vm6  ;;  %vm109_vm6 = vcmp.eq.s32.totalorder %v904_v40, %v106_v60 }
  0x95   :  { %vm983_vm12 = vmor %vm953_vm5, %vm86_vm7  ;;  %vm110_vm7 = vcmp.eq.s32.totalorder %v910_v43, %v106_v60 }
  0x96   :  { %vm991_vm14 = vmor %vm963_vm8, %vm95_vm11  ;;  %v226_v44 = vpop.permute.xlu2 %225 }
  0x97   :  { %vm100_vm0 = vmor %vm969_vm9, %vm96_vm13 }
  0x98   :  { %vm101_vm3 = vmor %vm975_vm10, %vm97_vm15  ;;  %vm119_vm10 = vcmp.eq.s32.totalorder %v898_v34, %v118_v10  ;;  %vm122_vm15 = vcmp.eq.s32.totalorder %v910_v43, %v118_v10 }
  0x99   :  { %vm102_vm5 = vmor %vm983_vm12, %vm98_vm2  ;;  %vm120_vm12 = vcmp.eq.s32.totalorder %v901_v36, %v118_v10  ;;  %vm131_vm2 = vcmp.eq.s32.totalorder %v898_v34, %v130_v12 }
  0x9a   :  { %vm111_vm8 = vmor %vm991_vm14, %vm107_vm1  ;;  %vm121_vm14 = vcmp.eq.s32.totalorder %v904_v40, %v118_v10  ;;  %v202_v41 = vpop.permute.xlu0 %201 }
  0x9b   :  { %vm1011_vm9 = vmor %vm100_vm0, %vm108_vm4  ;;  %vm132_vm4 = vcmp.eq.s32.totalorder %v901_v36, %v130_v12  ;;  %v154_v29 = vpop.permute.xlu1 %153 }
  0x9c   :  { %vm1016_vm11 = vmor %vm101_vm3, %vm109_vm6  ;;  %vm133_vm6 = vcmp.eq.s32.totalorder %v904_v40, %v130_v12 }
  0x9d   :  { %vm1021_vm13 = vmor %vm102_vm5, %vm110_vm7  ;;  %vm134_vm7 = vcmp.eq.s32.totalorder %v910_v43, %v130_v12 }
  0x9e   :  { %vm1027_vm0 = vmor %vm111_vm8, %vm119_vm10  ;;  %vm143_vm10 = vcmp.eq.s32.totalorder %v898_v34, %v142_v26 }
  0x9f   :  { %vm1033_vm1 = vmor %vm1011_vm9, %vm120_vm12  ;;  %vm144_vm12 = vcmp.eq.s32.totalorder %v901_v36, %v142_v26 }
  0xa0   :  { %vm1042_vm3 = vmor %vm1016_vm11, %vm121_vm14  ;;  %vm145_vm14 = vcmp.eq.s32.totalorder %v904_v40, %v142_v26 }
  0xa1   :  { %vm1051_vm5 = vmor %vm1021_vm13, %vm122_vm15  ;;  %vm146_vm15 = vcmp.eq.s32.totalorder %v910_v43, %v142_v26 }
  0xa2   :  { %vm1059_vm8 = vmor %vm1027_vm0, %vm131_vm2  ;;  %vm155_vm2 = vcmp.eq.s32.totalorder %v898_v34, %v154_v29 }
  0xa3   :  { %vm1065_vm9 = vmor %vm1033_vm1, %vm132_vm4  ;;  %vm156_vm4 = vcmp.eq.s32.totalorder %v901_v36, %v154_v29 }
  0xa4   :  { %vm137_vm11 = vmor %vm1042_vm3, %vm133_vm6  ;;  %vm157_vm6 = vcmp.eq.s32.totalorder %v904_v40, %v154_v29  ;;  %v178_v38 = vpop.permute.xlu1 %177 }
  0xa5   :  { %vm138_vm13 = vmor %vm1051_vm5, %vm134_vm7  ;;  %vm158_vm7 = vcmp.eq.s32.totalorder %v910_v43, %v154_v29 }
  0xa6   :  { %vm147_vm0 = vmor %vm1059_vm8, %vm143_vm10 }
  0xa7   :  { %vm148_vm1 = vmor %vm1065_vm9, %vm144_vm12  ;;  %vm167_vm9 = vcmp.eq.s32.totalorder %v898_v34, %v166_v37 }
  0xa8   :  { %vm149_vm3 = vmor %vm137_vm11, %vm145_vm14  ;;  %vm168_vm11 = vcmp.eq.s32.totalorder %v901_v36, %v166_v37 }
  0xa9   :  { %vm150_vm5 = vmor %vm138_vm13, %vm146_vm15  ;;  %vm169_vm13 = vcmp.eq.s32.totalorder %v904_v40, %v166_v37  ;;  %vm170_vm15 = vcmp.eq.s32.totalorder %v910_v43, %v166_v37 }
  0xaa   :  { %vm159_vm8 = vmor %vm147_vm0, %vm155_vm2 }
  0xab   :  { %vm160_vm10 = vmor %vm148_vm1, %vm156_vm4  ;;  %vm179_vm1 = vcmp.eq.s32.totalorder %v898_v34, %v178_v38 }
  0xac   :  { %vm161_vm12 = vmor %vm149_vm3, %vm157_vm6  ;;  %vm180_vm3 = vcmp.eq.s32.totalorder %v901_v36, %v178_v38 }
  0xad   :  { %vm162_vm14 = vmor %vm150_vm5, %vm158_vm7  ;;  %vm181_vm5 = vcmp.eq.s32.totalorder %v904_v40, %v178_v38  ;;  %vm182_vm7 = vcmp.eq.s32.totalorder %v910_v43, %v178_v38  ;;  %v214_v42 = vpop.permute.xlu1 %213 }
  0xae   :  { %vm171_vm0 = vmor %vm159_vm8, %vm167_vm9  ;;  %vm191_vm9 = vcmp.eq.s32.totalorder %v898_v34, %v190_v39 }
  0xaf   :  { %vm172_vm2 = vmor %vm160_vm10, %vm168_vm11  ;;  %vm192_vm11 = vcmp.eq.s32.totalorder %v901_v36, %v190_v39 }
  0xb0   :  { %vm173_vm4 = vmor %vm161_vm12, %vm169_vm13  ;;  %vm193_vm13 = vcmp.eq.s32.totalorder %v904_v40, %v190_v39 }
  0xb1   :  { %vm174_vm6 = vmor %vm162_vm14, %vm170_vm15  ;;  %vm194_vm15 = vcmp.eq.s32.totalorder %v910_v43, %v190_v39 }
  0xb2   :  { %vm183_vm8 = vmor %vm171_vm0, %vm179_vm1 }
  0xb3   :  { %vm184_vm10 = vmor %vm172_vm2, %vm180_vm3  ;;  %vm203_vm2 = vcmp.eq.s32.totalorder %v898_v34, %v202_v41 }
  0xb4   :  { %vm185_vm12 = vmor %vm173_vm4, %vm181_vm5  ;;  %vm204_vm4 = vcmp.eq.s32.totalorder %v901_v36, %v202_v41 }
  0xb5   :  { %vm186_vm14 = vmor %vm174_vm6, %vm182_vm7  ;;  %vm205_vm6 = vcmp.eq.s32.totalorder %v904_v40, %v202_v41  ;;  %vm206_vm7 = vcmp.eq.s32.totalorder %v910_v43, %v202_v41 }
  0xb6   :  { %vm195_vm0 = vmor %vm183_vm8, %vm191_vm9 }
  0xb7   :  { %vm196_vm1 = vmor %vm184_vm10, %vm192_vm11  ;;  %vm215_vm10 = vcmp.eq.s32.totalorder %v898_v34, %v214_v42 }
  0xb8   :  { %vm197_vm3 = vmor %vm185_vm12, %vm193_vm13  ;;  %vm227_vm12 = vcmp.eq.s32.totalorder %v898_v34, %v226_v44 }
  0xb9   :  { %vm198_vm5 = vmor %vm186_vm14, %vm194_vm15  ;;  %vm216_vm14 = vcmp.eq.s32.totalorder %v901_v36, %v214_v42  ;;  %vm228_vm15 = vcmp.eq.s32.totalorder %v901_v36, %v226_v44 }
  0xba   :  { %vm207_vm8 = vmor %vm195_vm0, %vm203_vm2  ;;  %vm217_vm2 = vcmp.eq.s32.totalorder %v904_v40, %v214_v42 }
  0xbb   :  { %vm208_vm9 = vmor %vm196_vm1, %vm204_vm4  ;;  %vm229_vm4 = vcmp.eq.s32.totalorder %v904_v40, %v226_v44 }
  0xbc   :  { %vm1104_vm11 = vmor %vm197_vm3, %vm205_vm6  ;;  %vm218_vm6 = vcmp.eq.s32.totalorder %v910_v43, %v214_v42 }
  0xbd   :  { %vm1109_vm13 = vmor %vm198_vm5, %vm206_vm7  ;;  %vm230_vm7 = vcmp.eq.s32.totalorder %v910_v43, %v226_v44 }
  0xbe   :  { %v1172_v46 = vsel %vm1109_vm13, 4294967295, %v1171_v46  ;;  %vm219_vm0 = vmor %vm207_vm8, %vm215_vm10 }
  0xbf   :  { %vm231_vm1 = vmor %vm219_vm0, %vm227_vm12  ;;  %vm1173_vm10 = vnez %v1172_v46 }
  0xc0   :  { %v574_v48 = vsel %vm231_vm1, 1.0, %v875_v47  ;;  %vm220_vm3 = vmor %vm208_vm9, %vm216_vm14 }
  0xc1   :  { %v243_v34 = vpack.c.bf16 %v574_v48, %v574_v48  ;;  %vm232_vm5 = vmor %vm220_vm3, %vm228_vm15 }
  0xc2   :  { %v575_v49 = vsel %vm232_vm5, 1.0, %v875_v47  ;;  %vm221_vm13 = vmor %vm1104_vm11, %vm217_vm2 }
  0xc3   :  { %511 = vmatmul.bf16.vlgmr.msra.gmra.mxu0 %v243_v34  ;;  %v244_v36 = vpack.c.bf16 %v575_v49, %v575_v49  ;;  %vm233_vm8 = vmor %vm221_vm13, %vm229_vm4 }
  0xc4   :  { %v576_v50 = vsel %vm233_vm8, 1.0, %v875_v47  ;;  %vm222_vm12 = vmor %vm1173_vm10, %vm218_vm6 }
  0xc5   :  { %524 = vmatmul.bf16.vlgmr.msra.gmra.mxu1 %v244_v36  ;;  %v245_v40 = vpack.c.bf16 %v576_v50, %v576_v50  ;;  %vm234_vm9 = vmor %vm222_vm12, %vm230_vm7 }
  0xc6   :  { %v577_v51 = vsel %vm234_vm9, 1.0, %v875_v47 }
  0xc7   :  { %537 = vmatmul.bf16.vlgmr.msra.gmra.mxu2 %v245_v40  ;;  %v246_v52 = vpack.c.bf16 %v577_v51, %v577_v51 }
  0xc9   :  { %550 = vmatmul.bf16.vlgmr.msra.gmra.mxu3 %v246_v52 }
 0x140   :  { %v512_v53 = vpop.f32.mrf.mxu0 }
 0x142   :  { %v525_v43 = vpop.f32.mrf.mxu1 }
 0x143   :  { %v526_v55 = vadd.f32 %v525_v43, %v512_v53 }
 0x148   :  { %v514_v54 = vpop.f32.mrf.mxu0 }
 0x14a   :  { %v538_v56 = vpop.f32.mrf.mxu2  ;;  %v527_v57 = vpop.f32.mrf.mxu1 }
 0x14b   :  { %v539_v58 = vadd.f32 %v538_v56, %v526_v55 }
 0x14c   :  { %v551_v59 = vpop.f32.mrf.mxu3 }
 0x14d   :  { %v552_v60 = vadd.f32 %v551_v59, %v539_v58 }
 0x14f   :  { %555 = vst [vmem:[#allocation7] sm:$0xff] %v552_v60 }
 0x150   :  { %566 = dma.vmem_to_hbm [thread:$0]  %s562_s1, 128, %s564_s23, [#allocation4]  }
 0x152   :  { %v540_v61 = vpop.f32.mrf.mxu2 }
 0x154   :  { %v553_v62 = vpop.f32.mrf.mxu3 }
 0x155   :  { %853 = dma.done.wait [#allocation4], 128  }
 0x156   :  { %854 = vsyncadd [#allocation4], 4294967168 }
 0x157   :  { %571 = vsyncpa [#allocation3], 1 }
 0x158   :  { %572 = vsyncpa [#allocation6], 1 }
 0x159   :  { %573 = vsyncpa [#allocation4], 1 }

</bundles_post_ra>
